<compile_context>
chip_gen: v7x
topology: tpu7x:2x2x1
jax: 0.10.0
libtpu: 0.0.40
codegen_flags: <defaults>
</compile_context>

<pallas_src>
import jax
import jax.numpy as jnp
from jax.experimental import pallas as pl
from jax.experimental.pallas import tpu as pltpu


def build_pe(d_model: int, max_len: int = 15) -> jnp.ndarray:
    """Deterministic PE buffer, shape (max_len, d_model).

    Faithfully mirrors the PyTorch __init__, including the POSITIVE exponent
    (div_term = 10000 ** (arange(0, d, 2) / d)) -- non-standard but that is
    what the reference module computes.
    """
    position = jnp.arange(max_len, dtype=jnp.float32).reshape((-1, 1))       # (L, 1)
    div_term = jnp.power(
        10000.0,
        jnp.arange(0, d_model, 2, dtype=jnp.float32).reshape((1, -1)) / d_model,
    )                                                                         # (1, ceil(d/2))
    angles = position * div_term                                              # (L, ceil(d/2))
    pe = jnp.zeros((max_len, d_model), dtype=jnp.float32)
    pe = pe.at[:, 0::2].set(jnp.sin(angles))
    # cos slots: floor(d/2) columns (handles odd d_model, where the reference
    # PyTorch code would raise a shape mismatch).
    pe = pe.at[:, 1::2].set(jnp.cos(angles[:, : d_model // 2]))
    return pe


def _add_pe_kernel(x_ref, pe_ref, o_ref):
    # x_ref: (ts, B, D); pe_ref: (ts, 1, D).  The batch broadcast is a free
    # sublane broadcast on the VPU.  Accumulate in f32, downcast exactly once.
    x = x_ref[...].astype(jnp.float32)
    p = pe_ref[...].astype(jnp.float32)
    o_ref[...] = (x + p).astype(o_ref.dtype)


def positional_encoding_forward(x: jnp.ndarray, pe: jnp.ndarray) -> jnp.ndarray:
    """x: (seq, batch, d_model); pe: (max_len, d_model). Returns x + pe[:S]."""
    S, B, D = x.shape

    # Tiny un-broadcast PE slab (S, 1, D) in x's dtype: no S*B*D wrapper
    # materialization, and no f32 side stream next to a bf16 activation.
    pe3 = pe[:S].astype(x.dtype).reshape(S, 1, D)

    # Sequence-axis tiling.  Target ~1 MiB of x per block: double-buffered
    # (x, pe, out) working set stays well under the scoped-VMEM default on
    # every generation (v5e 16 MiB, v6e/v7x 32 MiB).  For PCTE's real shapes
    # (S <= 15) this is a single block covering the whole array.
    itemsize = jnp.dtype(x.dtype).itemsize
    sublane = 16 if itemsize == 2 else 8
    row_bytes = B * D * itemsize
    target_bytes = 1 << 20
    ts = max(sublane, (target_bytes // max(row_bytes, 1)) // sublane * sublane)
    if S >= 2 * sublane:
        # Keep at least two grid steps so both v7x TensorCores get work.
        half = (((S + 1) // 2) + sublane - 1) // sublane * sublane
        ts = min(ts, half)
    ts = min(ts, S)  # block dim == full array dim is always legal

    grid = (pl.cdiv(S, ts),)
    x_spec = pl.BlockSpec((ts, B, D), lambda i: (i, 0, 0))
    pe_spec = pl.BlockSpec((ts, 1, D), lambda i: (i, 0, 0))

    return pl.pallas_call(
        _add_pe_kernel,
        out_shape=jax.ShapeDtypeStruct((S, B, D), x.dtype),
        grid=grid,
        in_specs=[x_spec, pe_spec],
        out_specs=x_spec,
        compiler_params=pltpu.CompilerParams(
            dimension_semantics=("parallel",),
        ),
    )(x, pe3)


if __name__ == "__main__":
    # Shapes implied by PCTE.forward: embeddings -> conv1(k=3) -> conv2(k=5)
    # gives (B, 15, 510); after transpose the PositionalEncoding sees
    # (seq=15, batch=B, d_model=510) with d_model = hidden_dim = 510.
    d_model = 510
    max_len = 15
    seq = 15
    batch = 2

    pe = build_pe(d_model, max_len)  # (max_len, d_model) deterministic buffer

    key = jax.random.PRNGKey(0)
    x = jax.random.normal(key, (seq, batch, d_model), dtype=jnp.float32)

    out = positional_encoding_forward(x, pe)
    out = jax.block_until_ready(out)

    # sanity check against the plain-JAX reference semantics
    ref = x + pe[:seq][:, None, :]
    assert out.shape == (seq, batch, d_model)
    assert jnp.allclose(out, ref, atol=1e-6), "mismatch vs reference"

    print("KERNEL_OK")
</pallas_src>

<mosaic_0001>
module attributes {stable_mosaic.version = 11 : i64} {
  func.func @_add_pe_kernel(%arg0: i32, %arg1: memref<15x2x510xf32, #tpu.memory_space<vmem>>, %arg2: memref<15x1x510xf32, #tpu.memory_space<vmem>>, %arg3: memref<15x2x510xf32, #tpu.memory_space<vmem>>) attributes {dimension_semantics = [#tpu.dimension_semantics<parallel>], iteration_bounds = array<i64: 1>, scalar_prefetch = 0 : i64, scratch_operands = 0 : i64, tpu.core_type = #tpu.core_type<tc>, window_params = [{transform_indices = @transform_0, window_bounds = array<i64: 15, 2, 510>}, {transform_indices = @transform_1, window_bounds = array<i64: 15, 1, 510>}, {transform_indices = @transform_2, window_bounds = array<i64: 15, 2, 510>}]} {
    %c0 = arith.constant 0 : index
    %c0_0 = arith.constant 0 : index
    %c0_1 = arith.constant 0 : index
    %0 = vector.load %arg1[%c0, %c0_0, %c0_1] : memref<15x2x510xf32, #tpu.memory_space<vmem>>, vector<15x2x510xf32>
    %c0_2 = arith.constant 0 : index
    %c0_3 = arith.constant 0 : index
    %c0_4 = arith.constant 0 : index
    %1 = vector.load %arg2[%c0_2, %c0_3, %c0_4] : memref<15x1x510xf32, #tpu.memory_space<vmem>>, vector<15x1x510xf32>
    %2 = vector.broadcast %1 : vector<15x1x510xf32> to vector<15x2x510xf32>
    %3 = arith.addf %0, %2 : vector<15x2x510xf32>
    %c0_5 = arith.constant 0 : index
    %c0_6 = arith.constant 0 : index
    %c0_7 = arith.constant 0 : index
    %4 = vector.load %arg3[%c0_5, %c0_6, %c0_7] : memref<15x2x510xf32, #tpu.memory_space<vmem>>, vector<15x2x510xf32>
    tpu.vector_store %arg3[%c0_5, %c0_6, %c0_7], %3 {strides = array<i32>} : memref<15x2x510xf32, #tpu.memory_space<vmem>>, vector<15x2x510xf32>,
    return
  }
  func.func @transform_0(%arg0: i32) -> (i32, i32, i32) {
    %c0_i32 = arith.constant 0 : i32
    %c0_i32_0 = arith.constant 0 : i32
    %c0_i32_1 = arith.constant 0 : i32
    return %arg0, %c0_i32, %c0_i32_0 : i32, i32, i32
  }
  func.func @transform_1(%arg0: i32) -> (i32, i32, i32) {
    %c0_i32 = arith.constant 0 : i32
    %c0_i32_0 = arith.constant 0 : i32
    %c0_i32_1 = arith.constant 0 : i32
    return %arg0, %c0_i32, %c0_i32_0 : i32, i32, i32
  }
  func.func @transform_2(%arg0: i32) -> (i32, i32, i32) {
    %c0_i32 = arith.constant 0 : i32
    %c0_i32_0 = arith.constant 0 : i32
    %c0_i32_1 = arith.constant 0 : i32
    return %arg0, %c0_i32, %c0_i32_0 : i32, i32, i32
  }
}

</mosaic_0001>

<bundles_post_ra>
// kernel: tpu_custom_call.1
= control target key start
LH: loop header
LB: loop body
LE: loop exit
PB: predicated region body
PF: predicated region fallthrough
CT: control target
= control target key end

     0   :  { %7 = vsyncpa [#allocation3], 0  ;;  %s937_s0 = inlined_call_operand.hbm [shape: f32[15,2,510], index: 0, kind: input, shape index: {}]   ;;  %s938_s1 = inlined_call_operand.hbm [shape: f32[15,1,510], index: 1, kind: input, shape index: {}]   ;;  %s939_s2 = inlined_call_operand.hbm [shape: f32[15,2,510], index: 2, kind: output, shape index: {}]  }
   0x1   :  { %8 = vsyncpa [#allocation6], 0 }
   0x2   :  { %9 = vsyncpa [#allocation4], 0  ;;  %s730_s9 = smov [#allocation2]   ;;  %s658_s13 = scalar_lea.hbm %s937_s0, 1920 }
   0x3   :  { %s15_s10 = sshll.u32 %s730_s9, 4  ;;  %p659_p0 = scmp.ne.s32.totalorder %s937_s0, %s658_s13  ;;  %s16_s10 = int_to_ptr.vmem [resolvable:$true] %s15_s10 }
   0x4   :  { %p662_p1 = scmp.lt.u32.totalorder %s658_s13, %s937_s0 }
   0x6   :  { %p664_p2 = pnand %p662_p1, %p659_p0 }
   0x8   :  { %667 = shalt.err (!%p664_p2)
}
   0x9   :  { %s668_s18 = scalar_lea.vmem %s16_s10, 1920  ;;  %p673_p4 = scmp.lt.s32.totalorder %s16_s10, %s16_s10 }
   0xa   :  { %p669_p3 = scmp.ne.s32.totalorder %s16_s10, %s668_s18  ;;  %p674_p5 = scmp.lt.s32.totalorder %s668_s18, %s668_s18 }
   0xc   :  { %p675_p6 = por %p674_p5, %p673_p4 }
   0xe   :  { %p676_p7 = pnand %p675_p6, %p669_p3 }
  0x10   :  { %679 = shalt.err (!%p676_p7)
}
  0x11   :  { %s731_s19 = smov 128   ;;  %s732_s20 = smov 8  }
  0x12   :  { %21 = dma.hbm_to_vmem [thread:$0]  %s937_s0, 1920, %s16_s10, [#allocation3], %s731_s19, %s731_s19, %s732_s20  }
  0x13   :  { %s733_s23 = smov [#allocation5]   ;;  %s680_s27 = scalar_lea.hbm %s938_s1, 960 }
  0x14   :  { %s27_s24 = sshll.u32 %s733_s23, 4  ;;  %p681_p8 = scmp.ne.s32.totalorder %s938_s1, %s680_s27  ;;  %s28_s24 = int_to_ptr.vmem [resolvable:$true] %s27_s24 }
  0x15   :  { %p684_p9 = scmp.lt.u32.totalorder %s680_s27, %s938_s1 }
  0x17   :  { %p686_p10 = pnand %p684_p9, %p681_p8 }
  0x19   :  { %689 = shalt.err (!%p686_p10)
}
  0x1a   :  { %s690_s4 = scalar_lea.vmem %s28_s24, 960  ;;  %p695_p12 = scmp.lt.s32.totalorder %s28_s24, %s28_s24 }
  0x1b   :  { %p691_p11 = scmp.ne.s32.totalorder %s28_s24, %s690_s4  ;;  %p696_p13 = scmp.lt.s32.totalorder %s690_s4, %s690_s4 }
  0x1d   :  { %p697_p0 = por %p696_p13, %p695_p12 }
  0x1f   :  { %p698_p1 = pnand %p697_p0, %p691_p11 }
  0x21   :  { %701 = shalt.err (!%p698_p1)
}
  0x22   :  { %s734_s0 = smov 64   ;;  %s735_s5 = smov 4  }
  0x23   :  { %33 = dma.hbm_to_vmem [thread:$0]  %s938_s1, 960, %s28_s24, [#allocation6], %s734_s0, %s734_s0, %s735_s5  }
  0x24   :  { %724 = dma.done.wait [#allocation3], 1920  }
  0x25   :  { %725 = vsyncadd [#allocation3], 4294965376 }
  0x26   :  { %726 = dma.done.wait [#allocation6], 960  }
  0x27   :  { %727 = vsyncadd [#allocation6], 4294966336  ;;  %v85_v0 = vlaneseq  ;;  %v736_v1 = vmov 1983009808   ;;  %vm610_vm0 = vcmask 1041408   ;;  %vm611_vm1 = vcmask 1043458  }
  0x28   :  { %v328_v2 = vunpack.c.l.s4 %v736_v1  ;;  %v55_v9 = vld [vmem:[#allocation5] sm:$0xf]  ;;  %vm613_vm2 = vcmask 1045508   ;;  %vm615_vm3 = vcmask 1031174   ;;  %v56_v15 = vld [vmem:[#allocation5 + $0x4] sm:$0xf]  ;;  %vm794_vm4 = vmor %vm611_vm1, %vm610_vm0 }
  0x29   :  { %v86_v3 = vshrl.u32 %v85_v0, 7  ;;  %v57_v16 = vld [vmem:[#allocation5 + $0x8] sm:$0xf]  ;;  %v58_v22 = vld [vmem:[#allocation5 + $0xc] sm:$0xf]  ;;  %vm614_vm5 = vmor %vm613_vm2, %vm794_vm4  ;;  %s737_s1 = smov [#allocation7]  }
  0x2a   :  { %v329_v4 = vunpack.c.0.s8 %v328_v2  ;;  %v59_v35 = vld [vmem:[#allocation5 + $0x10] sm:$0xf]  ;;  %v40_v36 = vld [vmem:[#allocation2] sm:$0xff]  ;;  %vm819_vm6 = vmor %vm615_vm3, %vm614_vm5  ;;  %s637_s8 = sshll.u32 %s737_s1, 4  ;;  %s638_s8 = int_to_ptr.vmem [resolvable:$true] %s637_s8 }
  0x2b   :  { %v780_v5 = vsub.s32 0, %v86_v3  ;;  %v782_v6 = vsub.s32 1, %v86_v3  ;;  %v784_v7 = vsub.s32 2, %v86_v3  ;;  %v786_v8 = vsub.s32 3, %v86_v3  ;;  %v41_v42 = vld [vmem:[#allocation2 + $0x8] sm:$0xff]  ;;  %v42_v53 = vld [vmem:[#allocation2 + $0x10] sm:$0xff]  ;;  %p707_p3 = scmp.lt.s32.totalorder %s638_s8, %s638_s8 }
  0x2c   :  { %v788_v10 = vsub.s32 %v329_v4, %v86_v3  ;;  %v60_v51 = vld [vmem:[#allocation5 + $0x14] sm:$0xf]  ;;  %v61_v61 = vld [vmem:[#allocation5 + $0x18] sm:$0xf]  ;;  %v43_v3 = vld [vmem:[#allocation2 + $0x18] sm:$0xff]  ;;  %s702_s9 = scalar_lea.vmem %s638_s8, 1920 }
  0x2d   :  { %v88_v11 = vrot.slane %v55_v9, %v780_v5  ;;  %v92_v12 = vrot.slane %v55_v9, %v782_v6  ;;  %v96_v13 = vrot.slane %v55_v9, %v784_v7  ;;  %v100_v14 = vrot.slane %v55_v9, %v786_v8  ;;  %p703_p2 = scmp.ne.s32.totalorder %s638_s8, %s702_s9  ;;  %p708_p4 = scmp.lt.s32.totalorder %s702_s9, %s702_s9 }
  0x2e   :  { %v104_v18 = vrot.slane %v56_v15, %v780_v5  ;;  %v108_v19 = vrot.slane %v56_v15, %v782_v6  ;;  %v112_v20 = vrot.slane %v56_v15, %v784_v7  ;;  %v116_v21 = vrot.slane %v56_v15, %v786_v8 }
  0x2f   :  { %v325_v23 = vcombine.low %v88_v11, %v92_v12  ;;  %v326_v24 = vcombine.low %v96_v13, %v100_v14  ;;  %v120_v25 = vrot.slane %v57_v16, %v780_v5  ;;  %v124_v26 = vrot.slane %v57_v16, %v782_v6  ;;  %v62_v12 = vld [vmem:[#allocation5 + $0x1c] sm:$0xf]  ;;  %p709_p5 = por %p708_p4, %p707_p3 }
  0x30   :  { %v342_v27 = vcombine.low %v104_v18, %v108_v19  ;;  %v343_v28 = vcombine.low %v112_v20, %v116_v21  ;;  %v128_v29 = vrot.slane %v57_v16, %v784_v7  ;;  %v132_v30 = vrot.slane %v57_v16, %v786_v8  ;;  %v63_v21 = vld [vmem:[#allocation5 + $0x20] sm:$0xf] }
  0x31   :  { %v333_v31 = vrot.slane %v325_v23, %v788_v10  ;;  %v340_v32 = vrot.slane %v326_v24, %v788_v10  ;;  %v359_v33 = vcombine.low %v120_v25, %v124_v26  ;;  %v136_v34 = vrot.slane %v58_v22, %v780_v5  ;;  %v44_v23 = vld [vmem:[#allocation2 + $0x20] sm:$0xff]  ;;  %p710_p6 = pnand %p709_p5, %p703_p2 }
  0x32   :  { %v350_v37 = vrot.slane %v342_v27, %v788_v10  ;;  %v357_v38 = vrot.slane %v343_v28, %v788_v10  ;;  %v360_v39 = vcombine.low %v128_v29, %v132_v30  ;;  %v140_v40 = vrot.slane %v58_v22, %v782_v6 }
  0x33   :  { %v341_v41 = vcombine.low %v333_v31, %v340_v32  ;;  %v367_v43 = vrot.slane %v359_v33, %v788_v10  ;;  %v144_v44 = vrot.slane %v58_v22, %v784_v7  ;;  %v148_v45 = vrot.slane %v58_v22, %v786_v8  ;;  %v45_v31 = vld [vmem:[#allocation2 + $0x28] sm:$0xff] }
  0x34   :  { %v358_v47 = vcombine.low %v350_v37, %v357_v38  ;;  %v374_v48 = vrot.slane %v360_v39, %v788_v10  ;;  %v376_v49 = vcombine.low %v136_v34, %v140_v40  ;;  %v152_v50 = vrot.slane %v59_v35, %v780_v5 }
  0x35   :  { %v595_v52 = vadd.f32 %v341_v41, %v40_v36  ;;  %v377_v54 = vcombine.low %v144_v44, %v148_v45  ;;  %v156_v55 = vrot.slane %v59_v35, %v782_v6  ;;  %v160_v56 = vrot.slane %v59_v35, %v784_v7  ;;  %v64_v36 = vld [vmem:[#allocation5 + $0x24] sm:$0xf]  ;;  %v65_v45 = vld [vmem:[#allocation5 + $0x28] sm:$0xf] }
  0x36   :  { %v596_v57 = vadd.f32 %v358_v47, %v41_v42  ;;  %v375_v58 = vcombine.low %v367_v43, %v374_v48  ;;  %v384_v59 = vrot.slane %v376_v49, %v788_v10  ;;  %v164_v60 = vrot.slane %v59_v35, %v786_v8  ;;  %v46_v48 = vld [vmem:[#allocation2 + $0x30] sm:$0xff] }
  0x37   :  { %617 = vst.msk [vmem:[#allocation7] sm:$0xff] %vm819_vm6, %v595_v52  ;;  %v391_v62 = vrot.slane %v377_v54, %v788_v10  ;;  %v393_v63 = vcombine.low %v152_v50, %v156_v55  ;;  %v168_v0 = vrot.slane %v60_v51, %v780_v5  ;;  %v172_v1 = vrot.slane %v60_v51, %v782_v6 }
  0x38   :  { %618 = vst.msk [vmem:[#allocation7 + $0x8] sm:$0xff] %vm819_vm6, %v596_v57  ;;  %v597_v2 = vadd.f32 %v375_v58, %v42_v53  ;;  %v394_v4 = vcombine.low %v160_v56, %v164_v60  ;;  %v176_v9 = vrot.slane %v60_v51, %v784_v7  ;;  %v180_v11 = vrot.slane %v60_v51, %v786_v8  ;;  %v47_v56 = vld [vmem:[#allocation2 + $0x38] sm:$0xff] }
  0x39   :  { %v392_v13 = vcombine.low %v384_v59, %v391_v62  ;;  %v401_v14 = vrot.slane %v393_v63, %v788_v10  ;;  %v410_v15 = vcombine.low %v168_v0, %v172_v1  ;;  %v184_v16 = vrot.slane %v61_v61, %v780_v5 }
  0x3a   :  { %619 = vst.msk [vmem:[#allocation7 + $0x10] sm:$0xff] %vm819_vm6, %v597_v2  ;;  %v408_v17 = vrot.slane %v394_v4, %v788_v10  ;;  %v411_v18 = vcombine.low %v176_v9, %v180_v11  ;;  %v188_v19 = vrot.slane %v61_v61, %v782_v6  ;;  %v192_v20 = vrot.slane %v61_v61, %v784_v7  ;;  %v67_v11 = vld [vmem:[#allocation5 + $0x30] sm:$0xf] }
  0x3b   :  { %v598_v22 = vadd.f32 %v392_v13, %v43_v3  ;;  %v418_v24 = vrot.slane %v410_v15, %v788_v10  ;;  %v196_v25 = vrot.slane %v61_v61, %v786_v8  ;;  %v200_v26 = vrot.slane %v62_v12, %v780_v5  ;;  %v66_v61 = vld [vmem:[#allocation5 + $0x2c] sm:$0xf] }
  0x3c   :  { %v409_v27 = vcombine.low %v401_v14, %v408_v17  ;;  %v425_v28 = vrot.slane %v411_v18, %v788_v10  ;;  %v427_v29 = vcombine.low %v184_v16, %v188_v19  ;;  %v204_v30 = vrot.slane %v62_v12, %v782_v6  ;;  %v48_v13 = vld [vmem:[#allocation2 + $0x40] sm:$0xff] }
  0x3d   :  { %620 = vst.msk [vmem:[#allocation7 + $0x18] sm:$0xff] %vm819_vm6, %v598_v22  ;;  %v428_v32 = vcombine.low %v192_v20, %v196_v25  ;;  %v208_v33 = vrot.slane %v62_v12, %v784_v7  ;;  %v212_v34 = vrot.slane %v62_v12, %v786_v8  ;;  %v216_v35 = vrot.slane %v63_v21, %v780_v5 }
  0x3e   :  { %v599_v37 = vadd.f32 %v409_v27, %v44_v23  ;;  %v426_v38 = vcombine.low %v418_v24, %v425_v28  ;;  %v435_v39 = vrot.slane %v427_v29, %v788_v10  ;;  %v444_v40 = vcombine.low %v200_v26, %v204_v30  ;;  %v68_v26 = vld [vmem:[#allocation5 + $0x34] sm:$0xf] }
  0x3f   :  { %v442_v41 = vrot.slane %v428_v32, %v788_v10  ;;  %v445_v42 = vcombine.low %v208_v33, %v212_v34  ;;  %v220_v43 = vrot.slane %v63_v21, %v782_v6  ;;  %v224_v44 = vrot.slane %v63_v21, %v784_v7 }
  0x40   :  { %621 = vst.msk [vmem:[#allocation7 + $0x20] sm:$0xff] %vm819_vm6, %v599_v37  ;;  %v600_v47 = vadd.f32 %v426_v38, %v45_v31  ;;  %v452_v49 = vrot.slane %v444_v40, %v788_v10  ;;  %v228_v50 = vrot.slane %v63_v21, %v786_v8  ;;  %v232_v51 = vrot.slane %v64_v36, %v780_v5  ;;  %v49_v21 = vld [vmem:[#allocation2 + $0x48] sm:$0xff]  ;;  %v50_v37 = vld [vmem:[#allocation2 + $0x50] sm:$0xff] }
  0x41   :  { %v443_v52 = vcombine.low %v435_v39, %v442_v41  ;;  %v459_v53 = vrot.slane %v445_v42, %v788_v10  ;;  %v461_v54 = vcombine.low %v216_v35, %v220_v43  ;;  %v236_v55 = vrot.slane %v64_v36, %v782_v6  ;;  %v69_v35 = vld [vmem:[#allocation5 + $0x38] sm:$0xf] }
  0x42   :  { %622 = vst.msk [vmem:[#allocation7 + $0x28] sm:$0xff] %vm819_vm6, %v600_v47  ;;  %v462_v57 = vcombine.low %v224_v44, %v228_v50  ;;  %v240_v58 = vrot.slane %v64_v36, %v784_v7  ;;  %v244_v59 = vrot.slane %v64_v36, %v786_v8  ;;  %v248_v60 = vrot.slane %v65_v45, %v780_v5 }
  0x43   :  { %v601_v62 = vadd.f32 %v443_v52, %v46_v48  ;;  %v460_v63 = vcombine.low %v452_v49, %v459_v53  ;;  %v469_v0 = vrot.slane %v461_v54, %v788_v10  ;;  %v478_v1 = vcombine.low %v232_v51, %v236_v55 }
  0x44   :  { %v476_v2 = vrot.slane %v462_v57, %v788_v10  ;;  %v479_v3 = vcombine.low %v240_v58, %v244_v59  ;;  %v252_v4 = vrot.slane %v65_v45, %v782_v6  ;;  %v256_v9 = vrot.slane %v65_v45, %v784_v7 }
  0x45   :  { %623 = vst.msk [vmem:[#allocation7 + $0x30] sm:$0xff] %vm819_vm6, %v601_v62  ;;  %v602_v12 = vadd.f32 %v460_v63, %v47_v56  ;;  %v486_v14 = vrot.slane %v478_v1, %v788_v10  ;;  %v260_v15 = vrot.slane %v65_v45, %v786_v8  ;;  %v264_v16 = vrot.slane %v66_v61, %v780_v5  ;;  %v51_v45 = vld [vmem:[#allocation2 + $0x58] sm:$0xff]  ;;  %v53_v1 = vld [vmem:[#allocation2 + $0x68] sm:$0xff] }
  0x46   :  { %v477_v17 = vcombine.low %v469_v0, %v476_v2  ;;  %v493_v18 = vrot.slane %v479_v3, %v788_v10  ;;  %v495_v19 = vcombine.low %v248_v60, %v252_v4  ;;  %v268_v20 = vrot.slane %v66_v61, %v782_v6  ;;  %v52_v60 = vld [vmem:[#allocation2 + $0x60] sm:$0xff] }
  0x47   :  { %624 = vst.msk [vmem:[#allocation7 + $0x38] sm:$0xff] %vm819_vm6, %v602_v12  ;;  %v496_v22 = vcombine.low %v256_v9, %v260_v15  ;;  %v272_v23 = vrot.slane %v66_v61, %v784_v7  ;;  %v276_v24 = vrot.slane %v66_v61, %v786_v8  ;;  %v280_v25 = vrot.slane %v67_v11, %v780_v5 }
  0x48   :  { %v603_v27 = vadd.f32 %v477_v17, %v48_v13  ;;  %v494_v28 = vcombine.low %v486_v14, %v493_v18  ;;  %v503_v29 = vrot.slane %v495_v19, %v788_v10  ;;  %v512_v30 = vcombine.low %v264_v16, %v268_v20 }
  0x49   :  { %v510_v31 = vrot.slane %v496_v22, %v788_v10  ;;  %v513_v32 = vcombine.low %v272_v23, %v276_v24  ;;  %v284_v33 = vrot.slane %v67_v11, %v782_v6  ;;  %v288_v34 = vrot.slane %v67_v11, %v784_v7 }
  0x4a   :  { %625 = vst.msk [vmem:[#allocation7 + $0x40] sm:$0xff] %vm819_vm6, %v603_v27  ;;  %v604_v36 = vadd.f32 %v494_v28, %v49_v21  ;;  %v520_v38 = vrot.slane %v512_v30, %v788_v10  ;;  %v292_v39 = vrot.slane %v67_v11, %v786_v8  ;;  %v296_v40 = vrot.slane %v68_v26, %v780_v5 }
  0x4b   :  { %v511_v41 = vcombine.low %v503_v29, %v510_v31  ;;  %v527_v42 = vrot.slane %v513_v32, %v788_v10  ;;  %v529_v43 = vcombine.low %v280_v25, %v284_v33  ;;  %v300_v44 = vrot.slane %v68_v26, %v782_v6 }
  0x4c   :  { %626 = vst.msk [vmem:[#allocation7 + $0x48] sm:$0xff] %vm819_vm6, %v604_v36  ;;  %v530_v47 = vcombine.low %v288_v34, %v292_v39  ;;  %v304_v48 = vrot.slane %v68_v26, %v784_v7  ;;  %v308_v49 = vrot.slane %v68_v26, %v786_v8  ;;  %v312_v50 = vrot.slane %v69_v35, %v780_v5 }
  0x4d   :  { %v605_v51 = vadd.f32 %v511_v41, %v50_v37  ;;  %v528_v52 = vcombine.low %v520_v38, %v527_v42  ;;  %v537_v53 = vrot.slane %v529_v43, %v788_v10  ;;  %v546_v54 = vcombine.low %v296_v40, %v300_v44 }
  0x4e   :  { %v544_v55 = vrot.slane %v530_v47, %v788_v10  ;;  %v547_v56 = vcombine.low %v304_v48, %v308_v49  ;;  %v316_v57 = vrot.slane %v69_v35, %v782_v6  ;;  %v320_v58 = vrot.slane %v69_v35, %v784_v7 }
  0x4f   :  { %627 = vst.msk [vmem:[#allocation7 + $0x50] sm:$0xff] %vm819_vm6, %v605_v51  ;;  %v606_v59 = vadd.f32 %v528_v52, %v51_v45  ;;  %v554_v61 = vrot.slane %v546_v54, %v788_v10  ;;  %v324_v5 = vrot.slane %v69_v35, %v786_v8  ;;  %v54_v8 = vld [vmem:[#allocation2 + $0x70] sm:$0xff] }
  0x50   :  { %v545_v62 = vcombine.low %v537_v53, %v544_v55  ;;  %v561_v63 = vrot.slane %v547_v56, %v788_v10  ;;  %v563_v0 = vcombine.low %v312_v50, %v316_v57 }
  0x51   :  { %628 = vst.msk [vmem:[#allocation7 + $0x58] sm:$0xff] %vm819_vm6, %v606_v59  ;;  %v564_v6 = vcombine.low %v320_v58, %v324_v5 }
  0x52   :  { %v607_v2 = vadd.f32 %v545_v62, %v52_v60  ;;  %v562_v7 = vcombine.low %v554_v61, %v561_v63  ;;  %v571_v3 = vrot.slane %v563_v0, %v788_v10 }
  0x53   :  { %v578_v4 = vrot.slane %v564_v6, %v788_v10 }
  0x54   :  { %629 = vst.msk [vmem:[#allocation7 + $0x60] sm:$0xff] %vm819_vm6, %v607_v2  ;;  %v608_v9 = vadd.f32 %v562_v7, %v53_v1 }
  0x55   :  { %v579_v11 = vcombine.low %v571_v3, %v578_v4 }
  0x56   :  { %630 = vst.msk [vmem:[#allocation7 + $0x68] sm:$0xff] %vm819_vm6, %v608_v9 }
  0x57   :  { %v609_v12 = vadd.f32 %v579_v11, %v54_v8 }
  0x59   :  { %631 = vst.msk [vmem:[#allocation7 + $0x70] sm:$0xff] %vm819_vm6, %v609_v12 }
  0x5a   :  { %713 = shalt.err (!%p710_p6)
}
  0x5b   :  { %s714_s12 = scalar_lea.hbm %s939_s2, 1920 }
  0x5c   :  { %p715_p7 = scmp.ne.s32.totalorder %s939_s2, %s714_s12  ;;  %p718_p8 = scmp.lt.u32.totalorder %s714_s12, %s939_s2 }
  0x5e   :  { %p720_p9 = pnand %p718_p8, %p715_p7 }
  0x60   :  { %723 = shalt.err (!%p720_p9)
}
  0x61   :  { %643 = dma.vmem_to_hbm [thread:$0]  %s638_s8, 1920, %s939_s2, [#allocation4], %s731_s19, %s731_s19, %s732_s20  }
  0x62   :  { %728 = dma.done.wait [#allocation4], 1920  }
  0x63   :  { %729 = vsyncadd [#allocation4], 4294965376 }
  0x64   :  { %647 = vsyncpa [#allocation3], 1 }
  0x65   :  { %648 = vsyncpa [#allocation6], 1 }
  0x66   :  { %649 = vsyncpa [#allocation4], 1 }

</bundles_post_ra>
